<compile_context>
chip_gen: v6e
topology: v6e:2x2x1
jax: 0.10.0
libtpu: 0.0.40
codegen_flags: <defaults>
</compile_context>

<pallas_src>
import functools

import jax
import jax.numpy as jnp
from jax.experimental import pallas as pl
from jax.experimental.pallas import tpu as pltpu

LANES = 128
MAX_TILE_ROWS = 1024
VMEM_LIMIT_BYTES = 48 * 1024 * 1024  # safe on v7x (64 MiB part) and below


def _round_up(a, m):
    return (a + m - 1) // m * m


def _bf16_vpu_available():
    # v6e / v7x have bf16-native VPUs; v5e and older do not (bf16 pointwise
    # ops would be emulated), so keep the epilogue in f32 there.
    try:
        kind = jax.devices()[0].device_kind.lower()
    except Exception:
        return False
    return ("v6" in kind) or ("v7" in kind)


ACT_DTYPE = jnp.bfloat16 if _bf16_vpu_available() else jnp.float32


def melresnet_kernel(x_ref, w_in_ref, b0_ref, w1_ref, b1_ref, w2_ref, b2_ref,
                     w_out_ref, b_out_ref, o_ref, *, act_dtype):
    # x_ref:     (TM, KCp)     bf16  im2col'd input rows (lane-padded width)
    # w_in_ref:  (KCp, Cdp)    bf16  conv_in weight, BN0 scale folded, padded
    # b0_ref:    (1, Cdp)      f32   BN0 shift
    # w1_ref:    (R, Cdp, Cdp) bf16  res-block conv1 (BN1 scale folded)
    # b1_ref:    (R, Cdp)      f32   BN1 shift
    # w2_ref:    (R, Cdp, Cdp) bf16  res-block conv2 (BN2 scale folded)
    # b2_ref:    (R, Cdp)      f32   BN2 shift
    # w_out_ref: (Cdp, Cop)    bf16  conv_out weight, lane-padded
    # b_out_ref: (1, Cop)      f32   conv_out bias, lane-padded
    # o_ref:     (TM, Cop)     f32
    R = w1_ref.shape[0]

    # conv_in (+ folded BN scale) as one wide MXU matmul, then shift + ReLU.
    h = jnp.dot(x_ref[...], w_in_ref[...], preferred_element_type=jnp.float32)
    h = jnp.maximum(h.astype(act_dtype) + b0_ref[...].astype(act_dtype),
                    0.0).astype(act_dtype)

    # residual blocks: 1x1 convs are pure channel matmuls (f32 MXU accum,
    # act_dtype pointwise epilogue).
    for r in range(R):  # static unroll
        t = jnp.dot(h.astype(jnp.bfloat16), w1_ref[r],
                    preferred_element_type=jnp.float32).astype(act_dtype)
        t = jnp.maximum(t + b1_ref[r:r + 1, :].astype(act_dtype), 0.0)
        t = jnp.dot(t.astype(jnp.bfloat16), w2_ref[r],
                    preferred_element_type=jnp.float32).astype(act_dtype)
        t = t + b2_ref[r:r + 1, :].astype(act_dtype)
        h = (h + t).astype(act_dtype)

    # conv_out (kernel_size=1, with bias), lane-dense 128-wide store.
    out = jnp.dot(h.astype(jnp.bfloat16), w_out_ref[...],
                  preferred_element_type=jnp.float32)
    o_ref[...] = (out + b_out_ref[...]).astype(o_ref.dtype)


def prepare_melresnet_params(w_in, bn0, w1, bn1, w2, bn2, w_out, b_out):
    """One-time (per checkpoint) weight preprocessing; call OUTSIDE the jitted
    forward.  Folds eval-mode BN scales, pads K*Cin / Cd / Co to 128-lane
    multiples, and casts matmul operands to bf16."""
    K, Cin, Cd = w_in.shape
    R = w1.shape[0]
    Co = w_out.shape[1]

    KCp = _round_up(max(K * Cin, LANES), LANES)
    Cdp = _round_up(max(Cd, LANES), LANES)
    Cop = _round_up(max(Co, LANES), LANES)

    # fold eval-mode BN scales into conv weights; shifts survive as biases
    w_in_f = (w_in * bn0[0][None, None, :]).reshape(K * Cin, Cd)
    b0 = bn0[1][None, :]                                    # (1, Cd)
    w1_f = w1 * bn1[:, 0, :][:, None, :]                    # (R, Cd, Cd)
    b1 = bn1[:, 1, :]                                       # (R, Cd)
    w2_f = w2 * bn2[:, 0, :][:, None, :]
    b2 = bn2[:, 1, :]

    # zero-pad to lane-dense shapes (padded channels stay exactly zero through
    # the whole network: zero weights, zero shifts, ReLU(0)=0, 0+0=0).
    w_in_p = jnp.zeros((KCp, Cdp), jnp.float32).at[:K * Cin, :Cd].set(w_in_f)
    b0_p = jnp.zeros((1, Cdp), jnp.float32).at[:, :Cd].set(b0)
    w1_p = jnp.zeros((R, Cdp, Cdp), jnp.float32).at[:, :Cd, :Cd].set(w1_f)
    b1_p = jnp.zeros((R, Cdp), jnp.float32).at[:, :Cd].set(b1)
    w2_p = jnp.zeros((R, Cdp, Cdp), jnp.float32).at[:, :Cd, :Cd].set(w2_f)
    b2_p = jnp.zeros((R, Cdp), jnp.float32).at[:, :Cd].set(b2)
    w_out_p = jnp.zeros((Cdp, Cop), jnp.float32).at[:Cd, :Co].set(w_out)
    b_out_p = jnp.zeros((1, Cop), jnp.float32).at[:, :Co].set(b_out)

    return dict(
        w_in=w_in_p.astype(jnp.bfloat16),
        b0=b0_p,
        w1=w1_p.astype(jnp.bfloat16),
        b1=b1_p,
        w2=w2_p.astype(jnp.bfloat16),
        b2=b2_p,
        w_out=w_out_p.astype(jnp.bfloat16),
        b_out=b_out_p,
    )


def _choose_row_tile(m):
    """Row tile: >= 2 grid steps whenever possible (keeps both v7x TensorCores
    busy on the 'parallel' axis), capped at MAX_TILE_ROWS (amortizes per-step
    overhead on v5e/v6e while bounding VMEM)."""
    m8 = _round_up(max(m, 8), 8)
    if m8 <= 8:
        return 8
    return max(8, min(MAX_TILE_ROWS, _round_up((m8 + 1) // 2, 8)))


@functools.partial(jax.jit, static_argnames=("k_size", "res_out_dims"))
def mel_resnet_pallas(x_ncl, params, *, k_size, res_out_dims):
    """x_ncl: (B, in_dims, T) PyTorch layout.  params: prepare_melresnet_params
    output.  Returns (B, res_out_dims, T_out), T_out = T - (k_size - 1)."""
    B, Cin, T = x_ncl.shape
    K = k_size
    Co = res_out_dims
    T_out = T - (K - 1)
    KCp, Cdp = params["w_in"].shape
    Cop = params["w_out"].shape[1]

    # ---- channels-last bf16 im2col, flattened to rows, lane-padded width ----
    x_btc = jnp.transpose(x_ncl, (0, 2, 1)).astype(jnp.bfloat16)     # (B, T, Cin)
    cols = jnp.concatenate([x_btc[:, k:k + T_out, :] for k in range(K)],
                           axis=-1)                                   # (B, T_out, K*Cin)
    M = B * T_out
    x2d = cols.reshape(M, K * Cin)

    TM = _choose_row_tile(M)
    M_pad = _round_up(M, TM)
    x2d = jnp.pad(x2d, ((0, M_pad - M), (0, KCp - K * Cin)))

    def const_spec(a):
        # Constant across the grid: single-buffer instead of default double.
        return pl.BlockSpec(a.shape, lambda i: (0,) * a.ndim,
                            pipeline_mode=pl.Buffered(1))

    kernel = functools.partial(melresnet_kernel, act_dtype=ACT_DTYPE)

    out2d = pl.pallas_call(
        kernel,
        out_shape=jax.ShapeDtypeStruct((M_pad, Cop), jnp.float32),
        grid_spec=pltpu.PrefetchScalarGridSpec(
            num_scalar_prefetch=0,
            grid=(M_pad // TM,),
            in_specs=[
                pl.BlockSpec((TM, KCp), lambda i: (i, 0)),
                const_spec(params["w_in"]),
                const_spec(params["b0"]),
                const_spec(params["w1"]),
                const_spec(params["b1"]),
                const_spec(params["w2"]),
                const_spec(params["b2"]),
                const_spec(params["w_out"]),
                const_spec(params["b_out"]),
            ],
            out_specs=pl.BlockSpec((TM, Cop), lambda i: (i, 0)),
        ),
        compiler_params=pltpu.CompilerParams(
            dimension_semantics=("parallel",),
            vmem_limit_bytes=VMEM_LIMIT_BYTES),
    )(x2d, params["w_in"], params["b0"], params["w1"], params["b1"],
      params["w2"], params["b2"], params["w_out"], params["b_out"])

    # Padded rows/lanes (which hold bias/ReLU garbage) are sliced off here.
    out = out2d[:M, :Co].reshape(B, T_out, Co)
    return jnp.transpose(out, (0, 2, 1))                              # (B, Co, T_out)


def mel_resnet_reference(x_ncl, w_in, bn0, w1, bn1, w2, bn2, w_out, b_out):
    """Pure-JAX f32 reference (same math as the PyTorch module, eval-mode BN)."""
    x = jnp.transpose(x_ncl, (0, 2, 1)).astype(jnp.float32)  # (B, T, Cin)
    K = w_in.shape[0]
    T_out = x.shape[1] - (K - 1)
    acc = jnp.zeros((x.shape[0], T_out, w_in.shape[2]), jnp.float32)
    for k in range(K):
        acc += jnp.einsum("btc,cd->btd", x[:, k:k + T_out, :], w_in[k])
    h = jnp.maximum(acc * bn0[0] + bn0[1], 0.0)
    for r in range(w1.shape[0]):
        t = jnp.einsum("btc,cd->btd", h, w1[r])
        t = jnp.maximum(t * bn1[r, 0] + bn1[r, 1], 0.0)
        t = jnp.einsum("btc,cd->btd", t, w2[r])
        t = t * bn2[r, 0] + bn2[r, 1]
        h = h + t
    out = jnp.einsum("btc,cd->btd", h, w_out) + b_out[0]
    return jnp.transpose(out, (0, 2, 1))


def make_params(key, res_blocks, in_dims, compute_dims, res_out_dims, pad):
    """Deterministic synthetic parameters, shaped per MelResNet.__init__."""
    K = pad * 2 + 1
    eps = 1e-5
    keys = iter(jax.random.split(key, 64))

    def bn_params(dims):
        gamma = jax.random.uniform(next(keys), (dims,), jnp.float32, 0.5, 1.5)
        beta = jax.random.normal(next(keys), (dims,), jnp.float32) * 0.1
        rmean = jax.random.normal(next(keys), (dims,), jnp.float32) * 0.1
        rvar = jax.random.uniform(next(keys), (dims,), jnp.float32, 0.5, 1.5)
        scale = gamma / jnp.sqrt(rvar + eps)
        shift = beta - rmean * scale
        return jnp.stack([scale, shift], axis=0)  # (2, dims)

    # conv_in.weight in PyTorch is (compute_dims, in_dims, K); store tap-major
    # (K, in_dims, compute_dims) for channels-last right-matmul.
    w_in_pt = jax.random.normal(next(keys), (compute_dims, in_dims, K),
                                jnp.float32) * 0.1
    w_in = jnp.transpose(w_in_pt, (2, 1, 0))

    bn0 = bn_params(compute_dims)

    w1_list, bn1_list, w2_list, bn2_list = [], [], [], []
    for _ in range(res_blocks):
        w1_pt = jax.random.normal(next(keys), (compute_dims, compute_dims, 1),
                                  jnp.float32) * 0.1
        w2_pt = jax.random.normal(next(keys), (compute_dims, compute_dims, 1),
                                  jnp.float32) * 0.1
        w1_list.append(jnp.transpose(w1_pt[:, :, 0], (1, 0)))  # (Cin, Cout)
        w2_list.append(jnp.transpose(w2_pt[:, :, 0], (1, 0)))
        bn1_list.append(bn_params(compute_dims))
        bn2_list.append(bn_params(compute_dims))
    w1 = jnp.stack(w1_list, 0)
    w2 = jnp.stack(w2_list, 0)
    bn1 = jnp.stack(bn1_list, 0)
    bn2 = jnp.stack(bn2_list, 0)

    w_out_pt = jax.random.normal(next(keys), (res_out_dims, compute_dims, 1),
                                 jnp.float32) * 0.1
    w_out = jnp.transpose(w_out_pt[:, :, 0], (1, 0))           # (Cd, Co)
    b_out = (jax.random.normal(next(keys), (res_out_dims,),
                               jnp.float32) * 0.1)[None, :]     # (1, Co)

    return w_in, bn0, w1, bn1, w2, bn2, w_out, b_out


if __name__ == "__main__":
    # Small config: MelResNet(res_blocks=3, in_dims=16, compute_dims=32,
    #                         res_out_dims=16, pad=2)  -> kernel_size 5
    res_blocks, in_dims, compute_dims, res_out_dims, pad = 3, 16, 32, 16, 2
    B, T = 2, 24
    k_size = pad * 2 + 1

    key = jax.random.PRNGKey(0)
    k_x, k_p = jax.random.split(key)
    x = jax.random.normal(k_x, (B, in_dims, T), jnp.float32)    # PyTorch NCL
    raw_params = make_params(k_p, res_blocks, in_dims, compute_dims,
                             res_out_dims, pad)

    # One-time weight preprocessing (outside the per-call jitted path).
    params = prepare_melresnet_params(*raw_params)
    params = jax.tree_util.tree_map(jax.block_until_ready, params)

    out = jax.block_until_ready(
        mel_resnet_pallas(x, params, k_size=k_size,
                          res_out_dims=res_out_dims))
    ref = mel_resnet_reference(x, *raw_params)

    assert out.shape == (B, res_out_dims, T - 2 * pad), out.shape
    # bf16 matmul operands / epilogue => looser tolerance vs the f32 reference.
    max_err = float(jnp.max(jnp.abs(out - ref)))
    assert max_err < 5e-2, max_err

    print("KERNEL_OK")
</pallas_src>

<mosaic_0001>
module attributes {stable_mosaic.version = 11 : i64} {
  func.func @melresnet_kernel(%arg0: i32, %arg1: memref<24x128xbf16, #tpu.memory_space<vmem>>, %arg2: memref<128x128xbf16, #tpu.memory_space<vmem>>, %arg3: memref<1x128xf32, #tpu.memory_space<vmem>>, %arg4: memref<3x128x128xbf16, #tpu.memory_space<vmem>>, %arg5: memref<3x128xf32, #tpu.memory_space<vmem>>, %arg6: memref<3x128x128xbf16, #tpu.memory_space<vmem>>, %arg7: memref<3x128xf32, #tpu.memory_space<vmem>>, %arg8: memref<128x128xbf16, #tpu.memory_space<vmem>>, %arg9: memref<1x128xf32, #tpu.memory_space<vmem>>, %arg10: memref<24x128xf32, #tpu.memory_space<vmem>>) attributes {dimension_semantics = [#tpu.dimension_semantics<parallel>], iteration_bounds = array<i64: 2>, scalar_prefetch = 0 : i64, scratch_operands = 0 : i64, tpu.core_type = #tpu.core_type<tc>, window_params = [{transform_indices = @transform_0, window_bounds = array<i64: 24, 128>}, {pipeline_mode = #tpu.pipeline_mode<synchronous>, transform_indices = @transform_1, window_bounds = array<i64: 128, 128>}, {pipeline_mode = #tpu.pipeline_mode<synchronous>, transform_indices = @transform_2, window_bounds = array<i64: 1, 128>}, {pipeline_mode = #tpu.pipeline_mode<synchronous>, transform_indices = @transform_3, window_bounds = array<i64: 3, 128, 128>}, {pipeline_mode = #tpu.pipeline_mode<synchronous>, transform_indices = @transform_4, window_bounds = array<i64: 3, 128>}, {pipeline_mode = #tpu.pipeline_mode<synchronous>, transform_indices = @transform_5, window_bounds = array<i64: 3, 128, 128>}, {pipeline_mode = #tpu.pipeline_mode<synchronous>, transform_indices = @transform_6, window_bounds = array<i64: 3, 128>}, {pipeline_mode = #tpu.pipeline_mode<synchronous>, transform_indices = @transform_7, window_bounds = array<i64: 128, 128>}, {pipeline_mode = #tpu.pipeline_mode<synchronous>, transform_indices = @transform_8, window_bounds = array<i64: 1, 128>}, {transform_indices = @transform_9, window_bounds = array<i64: 24, 128>}]} {
    %c0 = arith.constant 0 : index
    %c0_0 = arith.constant 0 : index
    %0 = vector.load %arg1[%c0, %c0_0] : memref<24x128xbf16, #tpu.memory_space<vmem>>, vector<24x128xbf16>
    %c0_1 = arith.constant 0 : index
    %c0_2 = arith.constant 0 : index
    %1 = vector.load %arg2[%c0_1, %c0_2] : memref<128x128xbf16, #tpu.memory_space<vmem>>, vector<128x128xbf16>
    %cst = arith.constant dense<0.000000e+00> : vector<24x128xf32>
    %2 = tpu.matmul %0, %1, %cst {dimension_numbers = #tpu.dot_dimension_numbers<[1], [0], [0], [1], [0, 0, 1, 1], [], []>} : vector<24x128xbf16>, vector<128x128xbf16>, vector<24x128xf32> -> vector<24x128xf32>
    %c0_3 = arith.constant 0 : index
    %c0_4 = arith.constant 0 : index
    %3 = vector.load %arg3[%c0_3, %c0_4] : memref<1x128xf32, #tpu.memory_space<vmem>>, vector<1x128xf32>
    %4 = vector.broadcast %3 : vector<1x128xf32> to vector<24x128xf32>
    %5 = arith.addf %2, %4 : vector<24x128xf32>
    %cst_5 = arith.constant 0.000000e+00 : f32
    %6 = vector.broadcast %cst_5 : f32 to vector<24x128xf32>
    %7 = arith.maximumf %5, %6 : vector<24x128xf32>
    %8 = arith.truncf %7 : vector<24x128xf32> to vector<24x128xbf16>
    %c0_6 = arith.constant 0 : index
    %c0_7 = arith.constant 0 : index
    %c0_8 = arith.constant 0 : index
    %9 = vector.load %arg4[%c0_6, %c0_7, %c0_8] : memref<3x128x128xbf16, #tpu.memory_space<vmem>>, vector<1x128x128xbf16>
    %10 = vector.shape_cast %9 : vector<1x128x128xbf16> to vector<128x128xbf16>
    %cst_9 = arith.constant dense<0.000000e+00> : vector<24x128xf32>
    %11 = tpu.matmul %8, %10, %cst_9 {dimension_numbers = #tpu.dot_dimension_numbers<[1], [0], [0], [1], [0, 0, 1, 1], [], []>} : vector<24x128xbf16>, vector<128x128xbf16>, vector<24x128xf32> -> vector<24x128xf32>
    %c0_10 = arith.constant 0 : index
    %c0_11 = arith.constant 0 : index
    %12 = vector.load %arg5[%c0_10, %c0_11] : memref<3x128xf32, #tpu.memory_space<vmem>>, vector<1x128xf32>
    %13 = vector.broadcast %12 : vector<1x128xf32> to vector<24x128xf32>
    %14 = arith.addf %11, %13 : vector<24x128xf32>
    %cst_12 = arith.constant 0.000000e+00 : f32
    %15 = vector.broadcast %cst_12 : f32 to vector<24x128xf32>
    %16 = arith.maximumf %14, %15 : vector<24x128xf32>
    %17 = arith.truncf %16 : vector<24x128xf32> to vector<24x128xbf16>
    %c0_13 = arith.constant 0 : index
    %c0_14 = arith.constant 0 : index
    %c0_15 = arith.constant 0 : index
    %18 = vector.load %arg6[%c0_13, %c0_14, %c0_15] : memref<3x128x128xbf16, #tpu.memory_space<vmem>>, vector<1x128x128xbf16>
    %19 = vector.shape_cast %18 : vector<1x128x128xbf16> to vector<128x128xbf16>
    %cst_16 = arith.constant dense<0.000000e+00> : vector<24x128xf32>
    %20 = tpu.matmul %17, %19, %cst_16 {dimension_numbers = #tpu.dot_dimension_numbers<[1], [0], [0], [1], [0, 0, 1, 1], [], []>} : vector<24x128xbf16>, vector<128x128xbf16>, vector<24x128xf32> -> vector<24x128xf32>
    %c0_17 = arith.constant 0 : index
    %c0_18 = arith.constant 0 : index
    %21 = vector.load %arg7[%c0_17, %c0_18] : memref<3x128xf32, #tpu.memory_space<vmem>>, vector<1x128xf32>
    %22 = vector.broadcast %21 : vector<1x128xf32> to vector<24x128xf32>
    %23 = arith.addf %20, %22 : vector<24x128xf32>
    %24 = arith.addf %7, %23 : vector<24x128xf32>
    %25 = arith.truncf %24 : vector<24x128xf32> to vector<24x128xbf16>
    %c1 = arith.constant 1 : index
    %c0_19 = arith.constant 0 : index
    %c0_20 = arith.constant 0 : index
    %26 = vector.load %arg4[%c1, %c0_19, %c0_20] : memref<3x128x128xbf16, #tpu.memory_space<vmem>>, vector<1x128x128xbf16>
    %27 = vector.shape_cast %26 : vector<1x128x128xbf16> to vector<128x128xbf16>
    %cst_21 = arith.constant dense<0.000000e+00> : vector<24x128xf32>
    %28 = tpu.matmul %25, %27, %cst_21 {dimension_numbers = #tpu.dot_dimension_numbers<[1], [0], [0], [1], [0, 0, 1, 1], [], []>} : vector<24x128xbf16>, vector<128x128xbf16>, vector<24x128xf32> -> vector<24x128xf32>
    %c1_22 = arith.constant 1 : index
    %c0_23 = arith.constant 0 : index
    %29 = vector.load %arg5[%c1_22, %c0_23] : memref<3x128xf32, #tpu.memory_space<vmem>>, vector<1x128xf32>
    %30 = vector.broadcast %29 : vector<1x128xf32> to vector<24x128xf32>
    %31 = arith.addf %28, %30 : vector<24x128xf32>
    %cst_24 = arith.constant 0.000000e+00 : f32
    %32 = vector.broadcast %cst_24 : f32 to vector<24x128xf32>
    %33 = arith.maximumf %31, %32 : vector<24x128xf32>
    %34 = arith.truncf %33 : vector<24x128xf32> to vector<24x128xbf16>
    %c1_25 = arith.constant 1 : index
    %c0_26 = arith.constant 0 : index
    %c0_27 = arith.constant 0 : index
    %35 = vector.load %arg6[%c1_25, %c0_26, %c0_27] : memref<3x128x128xbf16, #tpu.memory_space<vmem>>, vector<1x128x128xbf16>
    %36 = vector.shape_cast %35 : vector<1x128x128xbf16> to vector<128x128xbf16>
    %cst_28 = arith.constant dense<0.000000e+00> : vector<24x128xf32>
    %37 = tpu.matmul %34, %36, %cst_28 {dimension_numbers = #tpu.dot_dimension_numbers<[1], [0], [0], [1], [0, 0, 1, 1], [], []>} : vector<24x128xbf16>, vector<128x128xbf16>, vector<24x128xf32> -> vector<24x128xf32>
    %c1_29 = arith.constant 1 : index
    %c0_30 = arith.constant 0 : index
    %38 = vector.load %arg7[%c1_29, %c0_30] : memref<3x128xf32, #tpu.memory_space<vmem>>, vector<1x128xf32>
    %39 = vector.broadcast %38 : vector<1x128xf32> to vector<24x128xf32>
    %40 = arith.addf %37, %39 : vector<24x128xf32>
    %41 = arith.addf %24, %40 : vector<24x128xf32>
    %42 = arith.truncf %41 : vector<24x128xf32> to vector<24x128xbf16>
    %c2 = arith.constant 2 : index
    %c0_31 = arith.constant 0 : index
    %c0_32 = arith.constant 0 : index
    %43 = vector.load %arg4[%c2, %c0_31, %c0_32] : memref<3x128x128xbf16, #tpu.memory_space<vmem>>, vector<1x128x128xbf16>
    %44 = vector.shape_cast %43 : vector<1x128x128xbf16> to vector<128x128xbf16>
    %cst_33 = arith.constant dense<0.000000e+00> : vector<24x128xf32>
    %45 = tpu.matmul %42, %44, %cst_33 {dimension_numbers = #tpu.dot_dimension_numbers<[1], [0], [0], [1], [0, 0, 1, 1], [], []>} : vector<24x128xbf16>, vector<128x128xbf16>, vector<24x128xf32> -> vector<24x128xf32>
    %c2_34 = arith.constant 2 : index
    %c0_35 = arith.constant 0 : index
    %46 = vector.load %arg5[%c2_34, %c0_35] : memref<3x128xf32, #tpu.memory_space<vmem>>, vector<1x128xf32>
    %47 = vector.broadcast %46 : vector<1x128xf32> to vector<24x128xf32>
    %48 = arith.addf %45, %47 : vector<24x128xf32>
    %cst_36 = arith.constant 0.000000e+00 : f32
    %49 = vector.broadcast %cst_36 : f32 to vector<24x128xf32>
    %50 = arith.maximumf %48, %49 : vector<24x128xf32>
    %51 = arith.truncf %50 : vector<24x128xf32> to vector<24x128xbf16>
    %c2_37 = arith.constant 2 : index
    %c0_38 = arith.constant 0 : index
    %c0_39 = arith.constant 0 : index
    %52 = vector.load %arg6[%c2_37, %c0_38, %c0_39] : memref<3x128x128xbf16, #tpu.memory_space<vmem>>, vector<1x128x128xbf16>
    %53 = vector.shape_cast %52 : vector<1x128x128xbf16> to vector<128x128xbf16>
    %cst_40 = arith.constant dense<0.000000e+00> : vector<24x128xf32>
    %54 = tpu.matmul %51, %53, %cst_40 {dimension_numbers = #tpu.dot_dimension_numbers<[1], [0], [0], [1], [0, 0, 1, 1], [], []>} : vector<24x128xbf16>, vector<128x128xbf16>, vector<24x128xf32> -> vector<24x128xf32>
    %c2_41 = arith.constant 2 : index
    %c0_42 = arith.constant 0 : index
    %55 = vector.load %arg7[%c2_41, %c0_42] : memref<3x128xf32, #tpu.memory_space<vmem>>, vector<1x128xf32>
    %56 = vector.broadcast %55 : vector<1x128xf32> to vector<24x128xf32>
    %57 = arith.addf %54, %56 : vector<24x128xf32>
    %58 = arith.addf %41, %57 : vector<24x128xf32>
    %59 = arith.truncf %58 : vector<24x128xf32> to vector<24x128xbf16>
    %c0_43 = arith.constant 0 : index
    %c0_44 = arith.constant 0 : index
    %60 = vector.load %arg8[%c0_43, %c0_44] : memref<128x128xbf16, #tpu.memory_space<vmem>>, vector<128x128xbf16>
    %cst_45 = arith.constant dense<0.000000e+00> : vector<24x128xf32>
    %61 = tpu.matmul %59, %60, %cst_45 {dimension_numbers = #tpu.dot_dimension_numbers<[1], [0], [0], [1], [0, 0, 1, 1], [], []>} : vector<24x128xbf16>, vector<128x128xbf16>, vector<24x128xf32> -> vector<24x128xf32>
    %c0_46 = arith.constant 0 : index
    %c0_47 = arith.constant 0 : index
    %62 = vector.load %arg9[%c0_46, %c0_47] : memref<1x128xf32, #tpu.memory_space<vmem>>, vector<1x128xf32>
    %63 = vector.broadcast %62 : vector<1x128xf32> to vector<24x128xf32>
    %64 = arith.addf %61, %63 : vector<24x128xf32>
    %c0_48 = arith.constant 0 : index
    %c0_49 = arith.constant 0 : index
    %65 = vector.load %arg10[%c0_48, %c0_49] : memref<24x128xf32, #tpu.memory_space<vmem>>, vector<24x128xf32>
    tpu.vector_store %arg10[%c0_48, %c0_49], %64 {strides = array<i32>} : memref<24x128xf32, #tpu.memory_space<vmem>>, vector<24x128xf32>,
    return
  }
  func.func @transform_0(%arg0: i32) -> (i32, i32) {
    %c0_i32 = arith.constant 0 : i32
    %c0_i32_0 = arith.constant 0 : i32
    return %arg0, %c0_i32 : i32, i32
  }
  func.func @transform_1(%arg0: i32) -> (i32, i32) {
    %c0_i32 = arith.constant 0 : i32
    %c0_i32_0 = arith.constant 0 : i32
    %c0_i32_1 = arith.constant 0 : i32
    return %c0_i32, %c0_i32_0 : i32, i32
  }
  func.func @transform_2(%arg0: i32) -> (i32, i32) {
    %c0_i32 = arith.constant 0 : i32
    %c0_i32_0 = arith.constant 0 : i32
    %c0_i32_1 = arith.constant 0 : i32
    return %c0_i32, %c0_i32_0 : i32, i32
  }
  func.func @transform_3(%arg0: i32) -> (i32, i32, i32) {
    %c0_i32 = arith.constant 0 : i32
    %c0_i32_0 = arith.constant 0 : i32
    %c0_i32_1 = arith.constant 0 : i32
    %c0_i32_2 = arith.constant 0 : i32
    return %c0_i32, %c0_i32_0, %c0_i32_1 : i32, i32, i32
  }
  func.func @transform_4(%arg0: i32) -> (i32, i32) {
    %c0_i32 = arith.constant 0 : i32
    %c0_i32_0 = arith.constant 0 : i32
    %c0_i32_1 = arith.constant 0 : i32
    return %c0_i32, %c0_i32_0 : i32, i32
  }
  func.func @transform_5(%arg0: i32) -> (i32, i32, i32) {
    %c0_i32 = arith.constant 0 : i32
    %c0_i32_0 = arith.constant 0 : i32
    %c0_i32_1 = arith.constant 0 : i32
    %c0_i32_2 = arith.constant 0 : i32
    return %c0_i32, %c0_i32_0, %c0_i32_1 : i32, i32, i32
  }
  func.func @transform_6(%arg0: i32) -> (i32, i32) {
    %c0_i32 = arith.constant 0 : i32
    %c0_i32_0 = arith.constant 0 : i32
    %c0_i32_1 = arith.constant 0 : i32
    return %c0_i32, %c0_i32_0 : i32, i32
  }
  func.func @transform_7(%arg0: i32) -> (i32, i32) {
    %c0_i32 = arith.constant 0 : i32
    %c0_i32_0 = arith.constant 0 : i32
    %c0_i32_1 = arith.constant 0 : i32
    return %c0_i32, %c0_i32_0 : i32, i32
  }
  func.func @transform_8(%arg0: i32) -> (i32, i32) {
    %c0_i32 = arith.constant 0 : i32
    %c0_i32_0 = arith.constant 0 : i32
    %c0_i32_1 = arith.constant 0 : i32
    return %c0_i32, %c0_i32_0 : i32, i32
  }
  func.func @transform_9(%arg0: i32) -> (i32, i32) {
    %c0_i32 = arith.constant 0 : i32
    %c0_i32_0 = arith.constant 0 : i32
    return %arg0, %c0_i32 : i32, i32
  }
}

</mosaic_0001>

<bundles_post_ra>
// kernel: mel_resnet_pallas.1
= control target key start
LH: loop header
LB: loop body
LE: loop exit
PB: predicated region body
PF: predicated region fallthrough
CT: control target
= control target key end

     0   :  { %s1907_s30 = smov 0   ;;  %s2193_s0 = inlined_call_operand.vmem [shape: bf16[48,128], index: 0, kind: input, shape index: {}]   ;;  %s2194_s1 = inlined_call_operand.vmem [shape: bf16[128,128], index: 1, kind: input, shape index: {}]   ;;  %s2195_s2 = inlined_call_operand.vmem [shape: f32[1,128], index: 2, kind: input, shape index: {}]   ;;  %s2196_s3 = inlined_call_operand.vmem [shape: bf16[3,128,128], index: 3, kind: input, shape index: {}]   ;;  %s2197_s4 = inlined_call_operand.vmem [shape: f32[3,128], index: 4, kind: input, shape index: {}]   ;;  %s2198_s5 = inlined_call_operand.vmem [shape: bf16[3,128,128], index: 5, kind: input, shape index: {}]   ;;  %s2199_s6 = inlined_call_operand.vmem [shape: f32[3,128], index: 6, kind: input, shape index: {}]   ;;  %s2200_s7 = inlined_call_operand.vmem [shape: bf16[128,128], index: 7, kind: input, shape index: {}]   ;;  %s2201_s8 = inlined_call_operand.vmem [shape: f32[1,128], index: 8, kind: input, shape index: {}]   ;;  %s2202_s9 = inlined_call_operand.vmem [shape: f32[48,128], index: 9, kind: output, shape index: {}]  }
   0x1 LB: > { %s1388_s10 = sadd.s32 4294967295, %s1855_s30   ;;  %p1392_p0 = scmp.ge.s32.totalorder %s1855_s30, 1  ;;  %s1855_s30 = sphi %s1907_s30, %s19_s30  }
   0x2   : > { %p288_p1 = scmp.lt.s32.totalorder %s1855_s30, 3 }
   0x4   : > { %p289_p2 = pnand %p1392_p0, %p288_p1 }
   0x5   : > { %s324_s13 = smul.u32 (!%p289_p2), 3, %s1388_s10 }
   0x6   : > { %292 = sbr.rel (%p289_p2) target bundleno = 1688 (0x698), region = 56 }
   0x7   : > { %p325_p3 = scmp.lt.s32.totalorder (!%p289_p2), %s324_s13, 5 }
   0xb   : > { %v1783_v0 = vld [vmem:[%s2194_s1 + $0x38] sm:$0xff]   ;;  %v1784_v1 = vld [vmem:[%s2194_s1 + $0x30] sm:$0xff]   ;;  %v1785_v2 = vld [vmem:[%s2194_s1 + $0x28] sm:$0xff]   ;;  %s2204_s13 = smov (!%p325_p3, %s324_s13), 5 }
   0xc   : > { %1615 = vmatprep.subr.bf16.mxu0 %v1783_v0  ;;  %s1393_s18 = sshll.u32 %s2204_s13, 2  ;;  %v1786_v3 = vld [vmem:[%s2194_s1 + $0x20] sm:$0xff]   ;;  %v1793_v5 = vld [vmem:[%s2196_s3 + $0x38] sm:$0xff]   ;;  %v1794_v6 = vld [vmem:[%s2196_s3 + $0x30] sm:$0xff]   ;;  %s1394_s26 = sshll.u32 %s2204_s13, 3 }
   0xd   : > { %1616 = vmatpush3.bf16.msra.mxu0 %v1783_v0  ;;  %s1933_s23 = scalar_lea.vmem %s2193_s0, %s1393_s18  ;;  %v1787_v7 = vld [vmem:[%s2194_s1 + $0x18] sm:$0xff]   ;;  %1635 = vmatprep.subr.bf16.mxu1 %v1793_v5  ;;  %v1788_v8 = vld [vmem:[%s2194_s1 + $0x10] sm:$0xff]   ;;  %v1795_v9 = vld [vmem:[%s2196_s3 + $0x28] sm:$0xff]   ;;  %s334_s10 = scalar_lea.vmem %s2202_s9, %s1394_s26 }
   0xe   : > { %1617 = vmatprep.subr.bf16.mxu0 %v1784_v1  ;;  %v1791_v4 = vld [vmem:[%s1933_s23] sm:$0xff]   ;;  %1636 = vmatpush3.bf16.msra.mxu1 %v1793_v5  ;;  %v1789_v11 = vld [vmem:[%s2194_s1 + $0x8] sm:$0xff]   ;;  %v1797_v12 = vld [vmem:[%s2196_s3 + $0x18] sm:$0xff]  }
   0xf   : > { %1631 = vmatprep.mubr.bf16.mxu0 %v1791_v4  ;;  %1637 = vmatprep.subr.bf16.mxu1 %v1794_v6  ;;  %v1796_v10 = vld [vmem:[%s2196_s3 + $0x20] sm:$0xff]   ;;  %v1792_v14 = vld [vmem:[%s1933_s23 + $0x8] ss:$0 sps:$4 sm:$0xff]   ;;  %v1798_v15 = vld [vmem:[%s2196_s3 + $0x10] sm:$0xff]  }
  0x10   : > { %v1790_v13 = vld [vmem:[%s2194_s1] sm:$0xff]   ;;  %v1799_v16 = vld [vmem:[%s2196_s3 + $0x8] sm:$0xff]   ;;  %v1801_v18 = vld [vmem:[%s2198_s5 + $0x38] sm:$0xff]  }
  0x11   : > { %1618 = vmatpush3.bf16.msra.mxu0 %v1784_v1  ;;  %v1800_v17 = vld [vmem:[%s2196_s3] sm:$0xff]   ;;  %v1802_v19 = vld [vmem:[%s2198_s5 + $0x30] sm:$0xff]   ;;  %v1803_v20 = vld [vmem:[%s2198_s5 + $0x28] sm:$0xff]  }
  0x12   : > { %1619 = vmatprep.subr.bf16.mxu0 %v1785_v2  ;;  %1638 = vmatpush3.bf16.msra.mxu1 %v1794_v6  ;;  %v1804_v21 = vld [vmem:[%s2198_s5 + $0x20] sm:$0xff]   ;;  %v1805_v22 = vld [vmem:[%s2198_s5 + $0x18] sm:$0xff]   ;;  %v1806_v36 = vld [vmem:[%s2198_s5 + $0x10] sm:$0xff]  }
  0x13   : > { %1639 = vmatprep.subr.bf16.mxu1 %v1795_v9  ;;  %v1395_v24 = vld [vmem:[%s2195_s2] ss:$0 sm:$0xff]  ;;  %v1807_v37 = vld [vmem:[%s2198_s5 + $0x8] sm:$0xff]   ;;  %v1809_v39 = vld [vmem:[%s2196_s3 + $0x78] sm:$0xff]  }
  0x14   : > { %v1808_v38 = vld [vmem:[%s2198_s5] sm:$0xff]   ;;  %v1810_v40 = vld [vmem:[%s2196_s3 + $0x70] sm:$0xff]   ;;  %v1811_v41 = vld [vmem:[%s2196_s3 + $0x68] sm:$0xff]  }
  0x15   : > { %1620 = vmatpush3.bf16.msra.mxu0 %v1785_v2  ;;  %v1812_v42 = vld [vmem:[%s2196_s3 + $0x60] sm:$0xff]   ;;  %v1813_v43 = vld [vmem:[%s2196_s3 + $0x58] sm:$0xff]   ;;  %v1814_v57 = vld [vmem:[%s2196_s3 + $0x50] sm:$0xff]  }
  0x16   : > { %1621 = vmatprep.subr.bf16.mxu0 %v1786_v3  ;;  %1640 = vmatpush3.bf16.msra.mxu1 %v1795_v9  ;;  %v1406_v45 = vld [vmem:[%s2197_s4] ss:$0 sm:$0xff]  ;;  %v1815_v58 = vld [vmem:[%s2196_s3 + $0x48] sm:$0xff]   ;;  %v1817_v60 = vld [vmem:[%s2198_s5 + $0x78] sm:$0xff]  }
  0x17   : > { %1641 = vmatprep.subr.bf16.mxu1 %v1796_v10  ;;  %v1816_v59 = vld [vmem:[%s2196_s3 + $0x40] sm:$0xff]   ;;  %v1818_v61 = vld [vmem:[%s2198_s5 + $0x70] sm:$0xff]   ;;  %v1819_v62 = vld [vmem:[%s2198_s5 + $0x68] sm:$0xff]  }
  0x18   : > { %v1820_v63 = vld [vmem:[%s2198_s5 + $0x60] sm:$0xff]   ;;  %v1821_v0 = vld [vmem:[%s2198_s5 + $0x58] sm:$0xff]  }
  0x19   : > { %1622 = vmatpush3.bf16.msra.mxu0 %v1786_v3  ;;  %v1415_v2 = vld [vmem:[%s2199_s6] ss:$0 sm:$0xff] }
  0x1a   : > { %1623 = vmatprep.subr.bf16.mxu0 %v1787_v7  ;;  %1642 = vmatpush3.bf16.msra.mxu1 %v1796_v10 }
  0x1b   : > { %1643 = vmatprep.subr.bf16.mxu1 %v1797_v12 }
  0x1d   : > { %1624 = vmatpush3.bf16.msra.mxu0 %v1787_v7 }
  0x1e   : > { %1625 = vmatprep.subr.bf16.mxu0 %v1788_v8  ;;  %1644 = vmatpush3.bf16.msra.mxu1 %v1797_v12 }
  0x1f   : > { %1645 = vmatprep.subr.bf16.mxu1 %v1798_v15 }
  0x21   : > { %1626 = vmatpush3.bf16.msra.mxu0 %v1788_v8 }
  0x22   : > { %1627 = vmatprep.subr.bf16.mxu0 %v1789_v11  ;;  %1646 = vmatpush3.bf16.msra.mxu1 %v1798_v15  ;;  %v1823_v15 = vld [vmem:[%s2198_s5 + $0x48] sm:$0xff]  }
  0x23   : > { %1647 = vmatprep.subr.bf16.mxu1 %v1799_v16 }
  0x25   : > { %1628 = vmatpush3.bf16.msra.mxu0 %v1789_v11 }
  0x26   : > { %1629 = vmatprep.subr.bf16.mxu0 %v1790_v13  ;;  %1648 = vmatpush3.bf16.msra.mxu1 %v1799_v16  ;;  %v1824_v16 = vld [vmem:[%s2198_s5 + $0x40] sm:$0xff]  }
  0x27   : > { %1649 = vmatprep.subr.bf16.mxu1 %v1800_v17 }
  0x29   : > { %1630 = vmatpush3.bf16.msra.mxu0 %v1790_v13 }
  0x2a   : > { %1650 = vmatpush3.bf16.msra.mxu1 %v1800_v17  ;;  %1655 = vmatprep.subr.bf16.mxu0 %v1801_v18  ;;  %v1825_v17 = vld [vmem:[%s2196_s3 + $0xb8] sm:$0xff]  }
  0x2b   : > { %1675 = vmatprep.subr.bf16.mxu1 %v1809_v39 }
  0x2c   : > { %1632 = vmatmul.mubr.bf16.vlgmr.msra.gmra.mxu0 %v1792_v14  ;;  %v1822_v14 = vld [vmem:[%s2198_s5 + $0x50] sm:$0xff]  }
  0x2d   : > { %1656 = vmatpush3.bf16.msra.mxu0 %v1801_v18  ;;  %v1826_v18 = vld [vmem:[%s2196_s3 + $0xb0] sm:$0xff]  }
  0x2e   : > { %1657 = vmatprep.subr.bf16.mxu0 %v1802_v19 }
  0x31   : > { %1658 = vmatpush3.bf16.msra.mxu0 %v1802_v19  ;;  %v1827_v19 = vld [vmem:[%s2196_s3 + $0xa8] sm:$0xff]  }
  0x32   : > { %1659 = vmatprep.subr.bf16.mxu0 %v1803_v20 }
  0x35   : > { %1660 = vmatpush3.bf16.msra.mxu0 %v1803_v20  ;;  %v1828_v20 = vld [vmem:[%s2196_s3 + $0xa0] sm:$0xff]  }
  0x36   : > { %1661 = vmatprep.subr.bf16.mxu0 %v1804_v21 }
  0x39   : > { %1662 = vmatpush3.bf16.msra.mxu0 %v1804_v21  ;;  %v1829_v21 = vld [vmem:[%s2196_s3 + $0x98] sm:$0xff]  }
  0x3a   : > { %1663 = vmatprep.subr.bf16.mxu0 %v1805_v22 }
  0x3d   : > { %1664 = vmatpush3.bf16.msra.mxu0 %v1805_v22 }
  0x3e   : > { %1665 = vmatprep.subr.bf16.mxu0 %v1806_v36 }
  0x41   : > { %1666 = vmatpush3.bf16.msra.mxu0 %v1806_v36  ;;  %v1831_v36 = vld [vmem:[%s2196_s3 + $0x88] sm:$0xff]  }
  0x42   : > { %1667 = vmatprep.subr.bf16.mxu0 %v1807_v37 }
  0x45   : > { %1668 = vmatpush3.bf16.msra.mxu0 %v1807_v37  ;;  %v1832_v37 = vld [vmem:[%s2196_s3 + $0x80] sm:$0xff]  }
  0x46   : > { %1669 = vmatprep.subr.bf16.mxu0 %v1808_v38 }
  0x49   : > { %1670 = vmatpush3.bf16.msra.mxu0 %v1808_v38  ;;  %v1833_v38 = vld [vmem:[%s2198_s5 + $0xb8] sm:$0xff]  }
  0x4a   : > { %1695 = vmatprep.subr.bf16.mxu0 %v1817_v60 }
  0xec   : > { %v1633_v23 = vpop.f32.mrf.mxu0 }
  0xed   : > { %v464_v26 = vadd.f32 %v1633_v23, %v1395_v24  ;;  %v1440_v23 = vld [vmem:[%s2197_s4 + $0x1] ss:$0 sm:$0xff] }
  0xee   : > { %v455_v25 = vpop.f32.mrf.mxu0 }
  0xef   : > { %v1991_v28 = vadd.f32 %v1395_v24, %v455_v25  ;;  %v1995_v31 = vmax.f32 %v464_v26, 0.0 }
  0xf0   : > { %v1634_v27 = vpop.f32.mrf.mxu0 }
  0xf1   : > { %v469_v32 = vmax.f32 %v1991_v28, 0.0  ;;  %v473_v35 = vpack.c.bf16 %v1995_v31, %v1995_v31 }
  0xf2   : > { %v458_v29 = vpop.f32.mrf.mxu0 }
  0xf3   : > { %v1993_v30 = vadd.f32 %v1395_v24, %v458_v29 }
  0xf5   : > { %v470_v33 = vmax.f32 %v1993_v30, 0.0 }
  0xf7   : > { %v472_v34 = vpack.c.bf16 %v470_v33, %v469_v32 }
  0xf9   : > { %1651 = vmatprep.mubr.bf16.mxu1 %v472_v34 }
  0xfa   : > { %1652 = vmatmul.mubr.bf16.vlgmr.msra.gmra.mxu1 %v473_v35  ;;  %v1830_v35 = vld [vmem:[%s2196_s3 + $0x90] sm:$0xff]  }
  0xfb   : > { %1676 = vmatpush3.bf16.msra.mxu1 %v1809_v39  ;;  %v1834_v39 = vld [vmem:[%s2198_s5 + $0xb0] sm:$0xff]  }
  0xfc   : > { %1677 = vmatprep.subr.bf16.mxu1 %v1810_v40 }
  0xff   : > { %1678 = vmatpush3.bf16.msra.mxu1 %v1810_v40  ;;  %v1835_v40 = vld [vmem:[%s2198_s5 + $0xa8] sm:$0xff]  }
 0x100   : > { %1679 = vmatprep.subr.bf16.mxu1 %v1811_v41 }
 0x103   : > { %1680 = vmatpush3.bf16.msra.mxu1 %v1811_v41  ;;  %v1836_v41 = vld [vmem:[%s2198_s5 + $0xa0] sm:$0xff]  }
 0x104   : > { %1681 = vmatprep.subr.bf16.mxu1 %v1812_v42 }
 0x107   : > { %1682 = vmatpush3.bf16.msra.mxu1 %v1812_v42  ;;  %v1837_v42 = vld [vmem:[%s2198_s5 + $0x98] sm:$0xff]  }
 0x108   : > { %1683 = vmatprep.subr.bf16.mxu1 %v1813_v43 }
 0x10b   : > { %1684 = vmatpush3.bf16.msra.mxu1 %v1813_v43 }
 0x10c   : > { %1685 = vmatprep.subr.bf16.mxu1 %v1814_v57 }
 0x10f   : > { %1686 = vmatpush3.bf16.msra.mxu1 %v1814_v57  ;;  %v1839_v57 = vld [vmem:[%s2198_s5 + $0x88] sm:$0xff]  }
 0x110   : > { %1687 = vmatprep.subr.bf16.mxu1 %v1815_v58 }
 0x113   : > { %1688 = vmatpush3.bf16.msra.mxu1 %v1815_v58  ;;  %v1840_v58 = vld [vmem:[%s2198_s5 + $0x80] sm:$0xff]  }
 0x114   : > { %1689 = vmatprep.subr.bf16.mxu1 %v1816_v59 }
 0x117   : > { %1690 = vmatpush3.bf16.msra.mxu1 %v1816_v59  ;;  %v1841_v59 = vld [vmem:[%s2200_s7 + $0x38] sm:$0xff]  }
 0x118   : > { %1715 = vmatprep.subr.bf16.mxu1 %v1825_v17 }
 0x1ba   : > { %v1653_v44 = vpop.f32.mrf.mxu1 }
 0x1bb   : > { %v586_v47 = vadd.f32 %v1653_v44, %v1406_v45  ;;  %v1465_v44 = vld [vmem:[%s2199_s6 + $0x1] ss:$0 sm:$0xff] }
 0x1bc   : > { %v577_v46 = vpop.f32.mrf.mxu1 }
 0x1bd   : > { %v578_v49 = vadd.f32 %v1406_v45, %v577_v46  ;;  %v593_v52 = vmax.f32 %v586_v47, 0.0 }
 0x1be   : > { %v1654_v48 = vpop.f32.mrf.mxu1 }
 0x1bf   : > { %v591_v53 = vmax.f32 %v578_v49, 0.0  ;;  %v595_v56 = vpack.c.bf16 %v593_v52, %v593_v52 }
 0x1c0   : > { %v580_v50 = vpop.f32.mrf.mxu1 }
 0x1c1   : > { %v581_v51 = vadd.f32 %v1406_v45, %v580_v50 }
 0x1c3   : > { %v592_v54 = vmax.f32 %v581_v51, 0.0 }
 0x1c5   : > { %v594_v55 = vpack.c.bf16 %v592_v54, %v591_v53 }
 0x1c7   : > { %1671 = vmatprep.mubr.bf16.mxu0 %v594_v55 }
 0x1c8   : > { %1672 = vmatmul.mubr.bf16.vlgmr.msra.gmra.mxu0 %v595_v56  ;;  %v1838_v56 = vld [vmem:[%s2198_s5 + $0x90] sm:$0xff]  }
 0x1c9   : > { %1696 = vmatpush3.bf16.msra.mxu0 %v1817_v60  ;;  %v1842_v60 = vld [vmem:[%s2200_s7 + $0x30] sm:$0xff]  }
 0x1ca   : > { %1697 = vmatprep.subr.bf16.mxu0 %v1818_v61 }
 0x1cd   : > { %1698 = vmatpush3.bf16.msra.mxu0 %v1818_v61  ;;  %v1843_v61 = vld [vmem:[%s2200_s7 + $0x28] sm:$0xff]  }
 0x1ce   : > { %1699 = vmatprep.subr.bf16.mxu0 %v1819_v62 }
 0x1d1   : > { %1700 = vmatpush3.bf16.msra.mxu0 %v1819_v62  ;;  %v1844_v62 = vld [vmem:[%s2200_s7 + $0x20] sm:$0xff]  }
 0x1d2   : > { %1701 = vmatprep.subr.bf16.mxu0 %v1820_v63 }
 0x1d5   : > { %1702 = vmatpush3.bf16.msra.mxu0 %v1820_v63  ;;  %v1845_v63 = vld [vmem:[%s2200_s7 + $0x18] sm:$0xff]  }
 0x1d6   : > { %1703 = vmatprep.subr.bf16.mxu0 %v1821_v0 }
 0x1d9   : > { %1704 = vmatpush3.bf16.msra.mxu0 %v1821_v0 }
 0x1da   : > { %1705 = vmatprep.subr.bf16.mxu0 %v1822_v14 }
 0x1dd   : > { %1706 = vmatpush3.bf16.msra.mxu0 %v1822_v14  ;;  %v1847_v14 = vld [vmem:[%s2200_s7 + $0x8] sm:$0xff]  }
 0x1de   : > { %1707 = vmatprep.subr.bf16.mxu0 %v1823_v15 }
 0x1e1   : > { %1708 = vmatpush3.bf16.msra.mxu0 %v1823_v15  ;;  %v1848_v15 = vld [vmem:[%s2200_s7] sm:$0xff]  }
 0x1e2   : > { %1709 = vmatprep.subr.bf16.mxu0 %v1824_v16 }
 0x1e5   : > { %1710 = vmatpush3.bf16.msra.mxu0 %v1824_v16 }
 0x1e6   : > { %1735 = vmatprep.subr.bf16.mxu0 %v1833_v38 }
 0x288   : > { %v1673_v1 = vpop.f32.mrf.mxu0 }
 0x289   : > { %v708_v4 = vadd.f32 %v1673_v1, %v1415_v2  ;;  %v1490_v1 = vld [vmem:[%s2197_s4 + $0x2] ss:$0 sm:$0xff] }
 0x28a   : > { %v699_v3 = vpop.f32.mrf.mxu0 }
 0x28b   : > { %v700_v6 = vadd.f32 %v1415_v2, %v699_v3  ;;  %v2060_v9 = vadd.f32 %v708_v4, %v1995_v31 }
 0x28c   : > { %v1674_v5 = vpop.f32.mrf.mxu0 }
 0x28d   : > { %v2064_v10 = vadd.f32 %v700_v6, %v469_v32  ;;  %v717_v13 = vpack.c.bf16 %v2060_v9, %v2060_v9 }
 0x28e   : > { %v702_v7 = vpop.f32.mrf.mxu0 }
 0x28f   : > { %v703_v8 = vadd.f32 %v1415_v2, %v702_v7 }
 0x291   : > { %v2068_v11 = vadd.f32 %v703_v8, %v470_v33 }
 0x293   : > { %v716_v12 = vpack.c.bf16 %v2068_v11, %v2064_v10 }
 0x295   : > { %1691 = vmatprep.mubr.bf16.mxu1 %v716_v12 }
 0x296   : > { %1692 = vmatmul.mubr.bf16.vlgmr.msra.gmra.mxu1 %v717_v13  ;;  %v1846_v13 = vld [vmem:[%s2200_s7 + $0x10] sm:$0xff]  }
 0x297   : > { %1716 = vmatpush3.bf16.msra.mxu1 %v1825_v17  ;;  %v1515_v17 = vld [vmem:[%s2199_s6 + $0x2] ss:$0 sm:$0xff] }
 0x298   : > { %1717 = vmatprep.subr.bf16.mxu1 %v1826_v18 }
 0x29b   : > { %1718 = vmatpush3.bf16.msra.mxu1 %v1826_v18 }
 0x29c   : > { %1719 = vmatprep.subr.bf16.mxu1 %v1827_v19 }
 0x29f   : > { %1720 = vmatpush3.bf16.msra.mxu1 %v1827_v19 }
 0x2a0   : > { %1721 = vmatprep.subr.bf16.mxu1 %v1828_v20 }
 0x2a3   : > { %1722 = vmatpush3.bf16.msra.mxu1 %v1828_v20 }
 0x2a4   : > { %1723 = vmatprep.subr.bf16.mxu1 %v1829_v21 }
 0x2a7   : > { %1724 = vmatpush3.bf16.msra.mxu1 %v1829_v21 }
 0x2a8   : > { %1725 = vmatprep.subr.bf16.mxu1 %v1830_v35 }
 0x2ab   : > { %1726 = vmatpush3.bf16.msra.mxu1 %v1830_v35 }
 0x2ac   : > { %1727 = vmatprep.subr.bf16.mxu1 %v1831_v36 }
 0x2af   : > { %1728 = vmatpush3.bf16.msra.mxu1 %v1831_v36 }
 0x2b0   : > { %1729 = vmatprep.subr.bf16.mxu1 %v1832_v37 }
 0x2b3   : > { %1730 = vmatpush3.bf16.msra.mxu1 %v1832_v37 }
 0x2b4   : > { %1755 = vmatprep.subr.bf16.mxu1 %v1841_v59 }
 0x356   : > { %v1693_v22 = vpop.f32.mrf.mxu1 }
 0x357   : > { %v831_v25 = vadd.f32 %v1693_v22, %v1440_v23 }
 0x358   : > { %v822_v24 = vpop.f32.mrf.mxu1 }
 0x359   : > { %v823_v27 = vadd.f32 %v1440_v23, %v822_v24  ;;  %v838_v30 = vmax.f32 %v831_v25, 0.0 }
 0x35a   : > { %v1694_v26 = vpop.f32.mrf.mxu1 }
 0x35b   : > { %v836_v31 = vmax.f32 %v823_v27, 0.0  ;;  %v840_v34 = vpack.c.bf16 %v838_v30, %v838_v30 }
 0x35c   : > { %v825_v28 = vpop.f32.mrf.mxu1 }
 0x35d   : > { %v826_v29 = vadd.f32 %v1440_v23, %v825_v28 }
 0x35f   : > { %v837_v32 = vmax.f32 %v826_v29, 0.0  ;;  %v1524_v29 = vld [vmem:[%s2201_s8] ss:$0 sm:$0xff] }
 0x361   : > { %v839_v33 = vpack.c.bf16 %v837_v32, %v836_v31 }
 0x363   : > { %1711 = vmatprep.mubr.bf16.mxu0 %v839_v33 }
 0x364   : > { %1712 = vmatmul.mubr.bf16.vlgmr.msra.gmra.mxu0 %v840_v34 }
 0x365   : > { %1736 = vmatpush3.bf16.msra.mxu0 %v1833_v38 }
 0x366   : > { %1737 = vmatprep.subr.bf16.mxu0 %v1834_v39 }
 0x369   : > { %1738 = vmatpush3.bf16.msra.mxu0 %v1834_v39 }
 0x36a   : > { %1739 = vmatprep.subr.bf16.mxu0 %v1835_v40 }
 0x36d   : > { %1740 = vmatpush3.bf16.msra.mxu0 %v1835_v40 }
 0x36e   : > { %1741 = vmatprep.subr.bf16.mxu0 %v1836_v41 }
 0x371   : > { %1742 = vmatpush3.bf16.msra.mxu0 %v1836_v41 }
 0x372   : > { %1743 = vmatprep.subr.bf16.mxu0 %v1837_v42 }
 0x375   : > { %1744 = vmatpush3.bf16.msra.mxu0 %v1837_v42 }
 0x376   : > { %1745 = vmatprep.subr.bf16.mxu0 %v1838_v56 }
 0x379   : > { %1746 = vmatpush3.bf16.msra.mxu0 %v1838_v56 }
 0x37a   : > { %1747 = vmatprep.subr.bf16.mxu0 %v1839_v57 }
 0x37d   : > { %1748 = vmatpush3.bf16.msra.mxu0 %v1839_v57 }
 0x37e   : > { %1749 = vmatprep.subr.bf16.mxu0 %v1840_v58 }
 0x381   : > { %1750 = vmatpush3.bf16.msra.mxu0 %v1840_v58 }
 0x424   : > { %v1713_v43 = vpop.f32.mrf.mxu0 }
 0x425   : > { %v954_v46 = vadd.f32 %v1713_v43, %v1465_v44 }
 0x426   : > { %v945_v45 = vpop.f32.mrf.mxu0 }
 0x427   : > { %v946_v48 = vadd.f32 %v1465_v44, %v945_v45  ;;  %v2129_v51 = vadd.f32 %v954_v46, %v2060_v9 }
 0x428   : > { %v1714_v47 = vpop.f32.mrf.mxu0 }
 0x429   : > { %v2132_v52 = vadd.f32 %v946_v48, %v2064_v10  ;;  %v963_v55 = vpack.c.bf16 %v2129_v51, %v2129_v51 }
 0x42a   : > { %v948_v49 = vpop.f32.mrf.mxu0 }
 0x42b   : > { %v949_v50 = vadd.f32 %v1465_v44, %v948_v49 }
 0x42d   : > { %v2135_v53 = vadd.f32 %v949_v50, %v2068_v11 }
 0x42f   : > { %v962_v54 = vpack.c.bf16 %v2135_v53, %v2132_v52 }
 0x431   : > { %1731 = vmatprep.mubr.bf16.mxu1 %v962_v54 }
 0x432   : > { %1732 = vmatmul.mubr.bf16.vlgmr.msra.gmra.mxu1 %v963_v55 }
 0x433   : > { %1756 = vmatpush3.bf16.msra.mxu1 %v1841_v59 }
 0x434   : > { %1757 = vmatprep.subr.bf16.mxu1 %v1842_v60 }
 0x437   : > { %1758 = vmatpush3.bf16.msra.mxu1 %v1842_v60 }
 0x438   : > { %1759 = vmatprep.subr.bf16.mxu1 %v1843_v61 }
 0x43b   : > { %1760 = vmatpush3.bf16.msra.mxu1 %v1843_v61 }
 0x43c   : > { %1761 = vmatprep.subr.bf16.mxu1 %v1844_v62 }
 0x43f   : > { %1762 = vmatpush3.bf16.msra.mxu1 %v1844_v62 }
 0x440   : > { %1763 = vmatprep.subr.bf16.mxu1 %v1845_v63 }
 0x443   : > { %1764 = vmatpush3.bf16.msra.mxu1 %v1845_v63 }
 0x444   : > { %1765 = vmatprep.subr.bf16.mxu1 %v1846_v13 }
 0x447   : > { %1766 = vmatpush3.bf16.msra.mxu1 %v1846_v13 }
 0x448   : > { %1767 = vmatprep.subr.bf16.mxu1 %v1847_v14 }
 0x44b   : > { %1768 = vmatpush3.bf16.msra.mxu1 %v1847_v14 }
 0x44c   : > { %1769 = vmatprep.subr.bf16.mxu1 %v1848_v15 }
 0x44f   : > { %1770 = vmatpush3.bf16.msra.mxu1 %v1848_v15 }
 0x4f2   : > { %v1733_v0 = vpop.f32.mrf.mxu1 }
 0x4f3   : > { %v1077_v3 = vadd.f32 %v1733_v0, %v1490_v1 }
 0x4f4   : > { %v1068_v2 = vpop.f32.mrf.mxu1 }
 0x4f5   : > { %v1069_v5 = vadd.f32 %v1490_v1, %v1068_v2  ;;  %v1084_v8 = vmax.f32 %v1077_v3, 0.0 }
 0x4f6   : > { %v1734_v4 = vpop.f32.mrf.mxu1 }
 0x4f7   : > { %v1082_v9 = vmax.f32 %v1069_v5, 0.0  ;;  %v1086_v12 = vpack.c.bf16 %v1084_v8, %v1084_v8 }
 0x4f8   : > { %v1071_v6 = vpop.f32.mrf.mxu1 }
 0x4f9   : > { %v1072_v7 = vadd.f32 %v1490_v1, %v1071_v6 }
 0x4fb   : > { %v1083_v10 = vmax.f32 %v1072_v7, 0.0 }
 0x4fd   : > { %v1085_v11 = vpack.c.bf16 %v1083_v10, %v1082_v9 }
 0x4ff   : > { %1751 = vmatprep.mubr.bf16.mxu0 %v1085_v11 }
 0x500   : > { %1752 = vmatmul.mubr.bf16.vlgmr.msra.gmra.mxu0 %v1086_v12 }
 0x5c0   : > { %v1753_v16 = vpop.f32.mrf.mxu0 }
 0x5c1   : > { %v1200_v19 = vadd.f32 %v1753_v16, %v1515_v17 }
 0x5c2   : > { %v1191_v18 = vpop.f32.mrf.mxu0 }
 0x5c3   : > { %v1192_v21 = vadd.f32 %v1515_v17, %v1191_v18  ;;  %v1207_v24 = vadd.f32 %v1200_v19, %v2129_v51 }
 0x5c4   : > { %v1754_v20 = vpop.f32.mrf.mxu0 }
 0x5c5   : > { %v1205_v25 = vadd.f32 %v1192_v21, %v2132_v52  ;;  %v1209_v28 = vpack.c.bf16 %v1207_v24, %v1207_v24 }
 0x5c6   : > { %v1194_v22 = vpop.f32.mrf.mxu0 }
 0x5c7   : > { %v1195_v23 = vadd.f32 %v1515_v17, %v1194_v22 }
 0x5c9   : > { %v1206_v26 = vadd.f32 %v1195_v23, %v2135_v53 }
 0x5cb   : > { %v1208_v27 = vpack.c.bf16 %v1206_v26, %v1205_v25 }
 0x5cd   : > { %1771 = vmatprep.mubr.bf16.mxu1 %v1208_v27 }
 0x5ce   : > { %1772 = vmatmul.mubr.bf16.vlgmr.msra.gmra.mxu1 %v1209_v28 }
 0x68e   : > { %v1773_v30 = vpop.f32.mrf.mxu1 }
 0x68f   : > { %v1324_v31 = vadd.f32 %v1773_v30, %v1524_v29 }
 0x690   : > { %v1315_v32 = vpop.f32.mrf.mxu1 }
 0x691   : > { %1331 = vst [vmem:[%s334_s10 + $0x10] sm:$0xff] %v1324_v31  ;;  %v1316_v33 = vadd.f32 %v1524_v29, %v1315_v32 }
 0x692   : > { %v1774_v34 = vpop.f32.mrf.mxu1 }
 0x693   : > { %1329 = vst [vmem:[%s334_s10] sm:$0xff] %v1316_v33 }
 0x694   : > { %v1318_v35 = vpop.f32.mrf.mxu1 }
 0x695   : > { %v1319_v36 = vadd.f32 %v1524_v29, %v1318_v35 }
 0x697   : > { %1330 = vst [vmem:[%s334_s10 + $0x8] sm:$0xff] %v1319_v36 }
 0x698 PF: > { %s19_s30 = sadd.s32 1, %s1855_s30  }
 0x699   : > { %p16_p4 = scmp.ge.s32.totalorder %s19_s30, 4  }
 0x69b   :  { %18 = sbr.rel (!%p16_p4) target bundleno = 1 (0x1), region = 90 }

</bundles_post_ra>
